<compile_context>
chip_gen: v5e
topology: v5e:2x2
jax: 0.10.0
libtpu: 0.0.40
codegen_flags: <defaults>
</compile_context>

<pallas_src>
from functools import partial

import jax
import jax.numpy as jnp
from jax.experimental import pallas as pl
from jax.experimental.pallas import tpu as pltpu

HIDDEN = 128      # ray_hidden_dim == hidden_dim == 128
N_TASKS = 3
OUT_DIM = 2
NEG_INF = -1e9


def _bias_cols(size):
    """Lane-padded width of the fc_0_bias head (multiple of 128, >= 128)."""
    return max(HIDDEN, ((size + HIDDEN - 1) // HIDDEN) * HIDDEN)


# --------------------------------------------------------------------------
# Kernel
# --------------------------------------------------------------------------
def hyperfmp_kernel(ray_ref,
                    wf1, bf1,                      # fused layer-1 (ray_mlp | ray_mlp2)
                    w2, b2, w3, b3,                # ray_mlp layers 2, 3
                    a2w, a2b, a3w, a3b, a4w, a4b,  # ray_mlp2 layers 2, 3, 4
                    wh_hbm, bh,                    # fused fc_0_weights | fc_0_bias head
                    out_ref,                       # (1, head_cols + 128): [head | softmax]
                    wh_vmem, dma_sem,              # scratch: head-weight buffer + DMA sem
                    *, head_cols):
    f32 = jnp.float32
    bf16 = jnp.bfloat16

    # Start the big head-weight DMA immediately; it is only consumed by the
    # last matmul, so it hides behind the serial MLP chain below.
    head_cp = pltpu.make_async_copy(wh_hbm, wh_vmem, dma_sem)
    head_cp.start()

    def mm(x, w_ref, b_ref):
        # bf16 x bf16 MXU matmul, f32 accumulate, f32 bias added afterwards.
        return jnp.dot(x.astype(bf16), w_ref[...],
                       preferred_element_type=f32) + b_ref[...]

    x = ray_ref[...]                                   # (1, 128) f32, zero-padded ray

    # Fused first layers: cols 0:128 -> ray_mlp, cols 128:256 -> ray_mlp2.
    z = jnp.maximum(mm(x, wf1, bf1), 0.0)              # ReLU applies to both branches
    h = z[:, :HIDDEN]
    g = z[:, HIDDEN:]

    # ray_mlp: Linear -> ReLU -> Linear -> ReLU -> Linear
    h = jnp.maximum(mm(h, w2, b2), 0.0)
    feat = mm(h, w3, b3)                               # (1, 128)

    # ray_mlp2: Linear -> ReLU -> Linear -> ReLU -> Linear -> Linear -> softmax
    g = jnp.maximum(mm(g, a2w, a2b), 0.0)
    g = mm(g, a3w, a3b)                                # no ReLU (matches nn.Sequential)
    logits = mm(g, a4w, a4b)                           # padded lanes sit at -1e9
    m = jnp.max(logits, axis=-1, keepdims=True)
    e = jnp.exp(logits - m)                            # padded lanes underflow to 0 exactly
    # Exact reciprocal (single scalar): downstream code may rely on sum==1.
    wsoft = e / jnp.sum(e, axis=-1, keepdims=True)

    # Fused hypernet heads: [fc_0_weights (size*size) | fc_0_bias (padded)]
    head_cp.wait()
    head = mm(feat, wh_vmem, bh)

    # Single fused lane-dense output row: [head | softmax].
    out_ref[:, pl.ds(0, head_cols)] = head
    out_ref[:, pl.ds(head_cols, HIDDEN)] = wsoft


# --------------------------------------------------------------------------
# One-time parameter packing (amortized across calls)
# --------------------------------------------------------------------------
def prepare_packed_params(p, size):
    bf16 = jnp.bfloat16
    bias_cols = _bias_cols(size)

    def pad_rows(W, rows=HIDDEN):
        return jnp.zeros((rows, W.shape[1]), W.dtype).at[:W.shape[0], :].set(W)

    def pad_cols(W, cols):
        return jnp.zeros((W.shape[0], cols), W.dtype).at[:, :W.shape[1]].set(W)

    def row(b, cols=None, fill=0.0):
        n = b.shape[0]
        cols = n if cols is None else cols
        return jnp.full((1, cols), fill, jnp.float32).at[0, :n].set(b)

    W1, b1 = p['rm1']; W2, b2 = p['rm2']; W3, b3 = p['rm3']
    A1, c1 = p['r21']; A2, c2 = p['r22']; A3, c3 = p['r23']; A4, c4 = p['r24']
    Wf, bf_ = p['fcw']; Wb, bb = p['fcb']

    return {
        # fused first layer: (128, 256) bf16, (1, 256) f32
        'w_first': jnp.concatenate([pad_rows(W1), pad_rows(A1)], axis=1).astype(bf16),
        'b_first': jnp.concatenate([row(b1), row(c1)], axis=1),
        # ray_mlp
        'w2': W2.astype(bf16), 'b2': row(b2),
        'w3': W3.astype(bf16), 'b3': row(b3),
        # ray_mlp2
        'a2w': A2.astype(bf16), 'a2b': row(c2),
        'a3w': A3.astype(bf16), 'a3b': row(c3),
        'a4w': pad_cols(A4, HIDDEN).astype(bf16),
        'a4b': row(c4, HIDDEN, NEG_INF),            # -1e9 on padded softmax lanes
        # fused head: (128, size*size + bias_cols) bf16, f32 bias row
        'w_head': jnp.concatenate([Wf, pad_cols(Wb, bias_cols)], axis=1).astype(bf16),
        'b_head': jnp.concatenate([row(bf_), row(bb, bias_cols)], axis=1),
    }


# --------------------------------------------------------------------------
# Forward wrapper (per-call path: pad ray + one pallas_call, no grid)
# --------------------------------------------------------------------------
@partial(jax.jit, static_argnames=("size",))
def hyperfmp_forward(ray, packed, size):
    num_task = ray.shape[0]
    bias_cols = _bias_cols(size)
    head_cols = size * size + bias_cols
    out_cols = head_cols + HIDDEN

    ray_p = jnp.zeros((1, HIDDEN), jnp.float32).at[0, :num_task].set(
        ray.astype(jnp.float32))

    vmem = pl.BlockSpec(memory_space=pltpu.MemorySpace.VMEM)
    hbm = pl.BlockSpec(memory_space=pl.ANY)     # head weight: manual overlapped DMA

    # Roughly-accurate advisory cost so XLA overlaps surrounding HLOs.
    total_out_cols = 2 * HIDDEN + 5 * HIDDEN + head_cols
    flops = 2 * HIDDEN * total_out_cols
    bytes_accessed = (2 * HIDDEN * total_out_cols          # bf16 weights
                      + 4 * total_out_cols                  # f32 bias rows
                      + 4 * (HIDDEN + out_cols))            # ray in + fused row out
    cost = pl.CostEstimate(flops=flops, transcendentals=HIDDEN,
                           bytes_accessed=bytes_accessed)

    fused = pl.pallas_call(
        partial(hyperfmp_kernel, head_cols=head_cols),
        out_shape=jax.ShapeDtypeStruct((1, out_cols), jnp.float32),
        # grid omitted: single program, whole arrays resident, no pipeline
        # bookkeeping / double-buffering.
        in_specs=[vmem] * 13 + [hbm, vmem],
        out_specs=vmem,
        scratch_shapes=[pltpu.VMEM((HIDDEN, head_cols), jnp.bfloat16),
                        pltpu.SemaphoreType.DMA],
        compiler_params=pltpu.CompilerParams(vmem_limit_bytes=32 * 1024 * 1024),
        cost_estimate=cost,
    )(ray_p,
      packed['w_first'], packed['b_first'],
      packed['w2'], packed['b2'], packed['w3'], packed['b3'],
      packed['a2w'], packed['a2b'], packed['a3w'], packed['a3b'],
      packed['a4w'], packed['a4b'],
      packed['w_head'], packed['b_head'])

    out_dict = {
        'fc_0_weights': fused[0, :size * size].reshape(size, size),   # reshape(dim, prvs_dim)
        'fc_0_bias': fused[0, size * size:size * size + size],        # .flatten()
    }
    weights = fused[0, head_cols:head_cols + OUT_DIM]                 # softmax over dim 0 of (2,)
    return out_dict, weights


# --------------------------------------------------------------------------
# Parameter init + pure-JAX references
# --------------------------------------------------------------------------
def init_linear(key, fan_in, fan_out):
    """Deterministic PyTorch-style (uniform +-1/sqrt(fan_in)) init, (in,out) layout."""
    kw, kb = jax.random.split(key)
    bound = 1.0 / (fan_in ** 0.5)
    W = jax.random.uniform(kw, (fan_in, fan_out), jnp.float32, -bound, bound)
    b = jax.random.uniform(kb, (fan_out,), jnp.float32, -bound, bound)
    return W, b


def make_params(key, num_task, size):
    keys = jax.random.split(key, 9)
    return {
        'rm1': init_linear(keys[0], num_task, HIDDEN),
        'rm2': init_linear(keys[1], HIDDEN, HIDDEN),
        'rm3': init_linear(keys[2], HIDDEN, HIDDEN),
        'r21': init_linear(keys[3], N_TASKS, HIDDEN),
        'r22': init_linear(keys[4], HIDDEN, HIDDEN),
        'r23': init_linear(keys[5], HIDDEN, HIDDEN),
        'r24': init_linear(keys[6], HIDDEN, OUT_DIM),
        'fcw': init_linear(keys[7], HIDDEN, size * size),
        'fcb': init_linear(keys[8], HIDDEN, size),
    }


def _forward_with_lin(ray, p, size, lin):
    feat = lin(jax.nn.relu(lin(jax.nn.relu(lin(ray, p['rm1'])), p['rm2'])), p['rm3'])
    g = jax.nn.relu(lin(ray, p['r21']))
    g = jax.nn.relu(lin(g, p['r22']))
    g = lin(g, p['r23'])
    logits = lin(g, p['r24'])
    weights = jax.nn.softmax(logits, axis=0)
    out_dict = {
        'fc_0_weights': lin(feat, p['fcw']).reshape(size, size),
        'fc_0_bias': lin(feat, p['fcb']),
    }
    return out_dict, weights


def reference_forward(ray, p, size):
    """Pure-JAX f32 reference reproducing the PyTorch forward semantics."""
    return _forward_with_lin(ray, p, size, lambda x, wb: x @ wb[0] + wb[1])


def reference_forward_bf16(ray, p, size):
    """Pure-JAX reference mimicking the kernel numerics exactly:
    bf16 weights AND bf16 activations, f32 accumulation, f32 biases."""
    def lin(x, wb):
        W, b = wb
        return jnp.dot(x.astype(jnp.bfloat16), W.astype(jnp.bfloat16),
                       preferred_element_type=jnp.float32) + b
    return _forward_with_lin(ray, p, size, lin)


if __name__ == "__main__":
    size = 32            # self.dims = [size]; fc_0_weights is (size, size)
    num_task = N_TASKS   # ray feeds both ray_mlp and ray_mlp2, so num_task == 3

    root = jax.random.PRNGKey(0)
    k_params, k_ray = jax.random.split(root)
    params = make_params(k_params, num_task, size)
    ray = jax.random.uniform(k_ray, (num_task,), jnp.float32)

    packed = prepare_packed_params(params, size)   # one-time prep, reused per call
    jax.block_until_ready(packed)

    out_dict, weights = hyperfmp_forward(ray, packed, size=size)
    jax.block_until_ready((out_dict, weights))

    # Strict check: kernel vs a reference with identical numerics
    # (bf16 weights + bf16 activations, f32 accumulate).
    ref_dict_q, ref_w_q = reference_forward_bf16(ray, params, size)
    assert jnp.allclose(weights, ref_w_q, rtol=1e-2, atol=1e-3), "weights mismatch (bf16 ref)"
    assert jnp.allclose(out_dict['fc_0_weights'], ref_dict_q['fc_0_weights'],
                        rtol=1e-2, atol=1e-3), "fc_0_weights mismatch (bf16 ref)"
    assert jnp.allclose(out_dict['fc_0_bias'], ref_dict_q['fc_0_bias'],
                        rtol=1e-2, atol=1e-3), "fc_0_bias mismatch (bf16 ref)"

    # Loose check: semantic fidelity vs the original f32 module weights.
    # (Tolerances account for bf16 rounding of weights + activations at every dot.)
    ref_dict, ref_w = reference_forward(ray, params, size)
    assert jnp.allclose(weights, ref_w, rtol=5e-2, atol=1e-2), "weights mismatch (f32 ref)"
    assert jnp.allclose(out_dict['fc_0_weights'], ref_dict['fc_0_weights'],
                        rtol=5e-2, atol=2.5e-2), "fc_0_weights mismatch (f32 ref)"
    assert jnp.allclose(out_dict['fc_0_bias'], ref_dict['fc_0_bias'],
                        rtol=5e-2, atol=2.5e-2), "fc_0_bias mismatch (f32 ref)"

    print("KERNEL_OK")
</pallas_src>

<mosaic_0001>
module attributes {stable_mosaic.version = 11 : i64} {
  func.func @hyperfmp_kernel(%arg0: memref<1x128xf32, #tpu.memory_space<vmem>>, %arg1: memref<128x256xbf16, #tpu.memory_space<vmem>>, %arg2: memref<1x256xf32, #tpu.memory_space<vmem>>, %arg3: memref<128x128xbf16, #tpu.memory_space<vmem>>, %arg4: memref<1x128xf32, #tpu.memory_space<vmem>>, %arg5: memref<128x128xbf16, #tpu.memory_space<vmem>>, %arg6: memref<1x128xf32, #tpu.memory_space<vmem>>, %arg7: memref<128x128xbf16, #tpu.memory_space<vmem>>, %arg8: memref<1x128xf32, #tpu.memory_space<vmem>>, %arg9: memref<128x128xbf16, #tpu.memory_space<vmem>>, %arg10: memref<1x128xf32, #tpu.memory_space<vmem>>, %arg11: memref<128x128xbf16, #tpu.memory_space<vmem>>, %arg12: memref<1x128xf32, #tpu.memory_space<vmem>>, %arg13: memref<128x1152xbf16, #tpu.memory_space<any>>, %arg14: memref<1x1152xf32, #tpu.memory_space<vmem>>, %arg15: memref<1x1280xf32, #tpu.memory_space<vmem>>, %arg16: memref<128x1152xbf16, #tpu.memory_space<vmem>>, %arg17: memref<!tpu.dma_semaphore, #tpu.memory_space<semaphore_mem>>) attributes {dimension_semantics = [], scalar_prefetch = 0 : i64, scratch_operands = 2 : i64, tpu.core_type = #tpu.core_type<tc>} {
    tpu.enqueue_dma source(%arg13 : memref<128x1152xbf16, #tpu.memory_space<any>>) target(%arg16 : memref<128x1152xbf16, #tpu.memory_space<vmem>>) target_semaphore(%arg17 : memref<!tpu.dma_semaphore, #tpu.memory_space<semaphore_mem>>)
    %c0 = arith.constant 0 : index
    %c0_0 = arith.constant 0 : index
    %0 = vector.load %arg0[%c0, %c0_0] : memref<1x128xf32, #tpu.memory_space<vmem>>, vector<1x128xf32>
    %1 = arith.truncf %0 : vector<1x128xf32> to vector<1x128xbf16>
    %c0_1 = arith.constant 0 : index
    %c0_2 = arith.constant 0 : index
    %2 = vector.load %arg1[%c0_1, %c0_2] : memref<128x256xbf16, #tpu.memory_space<vmem>>, vector<128x256xbf16>
    %cst = arith.constant dense<0.000000e+00> : vector<1x256xf32>
    %3 = tpu.matmul %1, %2, %cst {dimension_numbers = #tpu.dot_dimension_numbers<[1], [0], [0], [1], [0, 0, 1, 1], [], []>} : vector<1x128xbf16>, vector<128x256xbf16>, vector<1x256xf32> -> vector<1x256xf32>
    %c0_3 = arith.constant 0 : index
    %c0_4 = arith.constant 0 : index
    %4 = vector.load %arg2[%c0_3, %c0_4] : memref<1x256xf32, #tpu.memory_space<vmem>>, vector<1x256xf32>
    %5 = arith.addf %3, %4 : vector<1x256xf32>
    %cst_5 = arith.constant 0.000000e+00 : f32
    %6 = vector.broadcast %cst_5 : f32 to vector<1x256xf32>
    %7 = arith.maximumf %5, %6 : vector<1x256xf32>
    %8 = vector.extract_strided_slice %7 {offsets = [0, 0], sizes = [1, 128], strides = [1, 1]} : vector<1x256xf32> to vector<1x128xf32>
    %9 = vector.extract_strided_slice %7 {offsets = [0, 128], sizes = [1, 128], strides = [1, 1]} : vector<1x256xf32> to vector<1x128xf32>
    %10 = arith.truncf %8 : vector<1x128xf32> to vector<1x128xbf16>
    %c0_6 = arith.constant 0 : index
    %c0_7 = arith.constant 0 : index
    %11 = vector.load %arg3[%c0_6, %c0_7] : memref<128x128xbf16, #tpu.memory_space<vmem>>, vector<128x128xbf16>
    %cst_8 = arith.constant dense<0.000000e+00> : vector<1x128xf32>
    %12 = tpu.matmul %10, %11, %cst_8 {dimension_numbers = #tpu.dot_dimension_numbers<[1], [0], [0], [1], [0, 0, 1, 1], [], []>} : vector<1x128xbf16>, vector<128x128xbf16>, vector<1x128xf32> -> vector<1x128xf32>
    %c0_9 = arith.constant 0 : index
    %c0_10 = arith.constant 0 : index
    %13 = vector.load %arg4[%c0_9, %c0_10] : memref<1x128xf32, #tpu.memory_space<vmem>>, vector<1x128xf32>
    %14 = arith.addf %12, %13 : vector<1x128xf32>
    %cst_11 = arith.constant 0.000000e+00 : f32
    %15 = vector.broadcast %cst_11 : f32 to vector<1x128xf32>
    %16 = arith.maximumf %14, %15 : vector<1x128xf32>
    %17 = arith.truncf %16 : vector<1x128xf32> to vector<1x128xbf16>
    %c0_12 = arith.constant 0 : index
    %c0_13 = arith.constant 0 : index
    %18 = vector.load %arg5[%c0_12, %c0_13] : memref<128x128xbf16, #tpu.memory_space<vmem>>, vector<128x128xbf16>
    %cst_14 = arith.constant dense<0.000000e+00> : vector<1x128xf32>
    %19 = tpu.matmul %17, %18, %cst_14 {dimension_numbers = #tpu.dot_dimension_numbers<[1], [0], [0], [1], [0, 0, 1, 1], [], []>} : vector<1x128xbf16>, vector<128x128xbf16>, vector<1x128xf32> -> vector<1x128xf32>
    %c0_15 = arith.constant 0 : index
    %c0_16 = arith.constant 0 : index
    %20 = vector.load %arg6[%c0_15, %c0_16] : memref<1x128xf32, #tpu.memory_space<vmem>>, vector<1x128xf32>
    %21 = arith.addf %19, %20 : vector<1x128xf32>
    %22 = arith.truncf %9 : vector<1x128xf32> to vector<1x128xbf16>
    %c0_17 = arith.constant 0 : index
    %c0_18 = arith.constant 0 : index
    %23 = vector.load %arg7[%c0_17, %c0_18] : memref<128x128xbf16, #tpu.memory_space<vmem>>, vector<128x128xbf16>
    %cst_19 = arith.constant dense<0.000000e+00> : vector<1x128xf32>
    %24 = tpu.matmul %22, %23, %cst_19 {dimension_numbers = #tpu.dot_dimension_numbers<[1], [0], [0], [1], [0, 0, 1, 1], [], []>} : vector<1x128xbf16>, vector<128x128xbf16>, vector<1x128xf32> -> vector<1x128xf32>
    %c0_20 = arith.constant 0 : index
    %c0_21 = arith.constant 0 : index
    %25 = vector.load %arg8[%c0_20, %c0_21] : memref<1x128xf32, #tpu.memory_space<vmem>>, vector<1x128xf32>
    %26 = arith.addf %24, %25 : vector<1x128xf32>
    %cst_22 = arith.constant 0.000000e+00 : f32
    %27 = vector.broadcast %cst_22 : f32 to vector<1x128xf32>
    %28 = arith.maximumf %26, %27 : vector<1x128xf32>
    %29 = arith.truncf %28 : vector<1x128xf32> to vector<1x128xbf16>
    %c0_23 = arith.constant 0 : index
    %c0_24 = arith.constant 0 : index
    %30 = vector.load %arg9[%c0_23, %c0_24] : memref<128x128xbf16, #tpu.memory_space<vmem>>, vector<128x128xbf16>
    %cst_25 = arith.constant dense<0.000000e+00> : vector<1x128xf32>
    %31 = tpu.matmul %29, %30, %cst_25 {dimension_numbers = #tpu.dot_dimension_numbers<[1], [0], [0], [1], [0, 0, 1, 1], [], []>} : vector<1x128xbf16>, vector<128x128xbf16>, vector<1x128xf32> -> vector<1x128xf32>
    %c0_26 = arith.constant 0 : index
    %c0_27 = arith.constant 0 : index
    %32 = vector.load %arg10[%c0_26, %c0_27] : memref<1x128xf32, #tpu.memory_space<vmem>>, vector<1x128xf32>
    %33 = arith.addf %31, %32 : vector<1x128xf32>
    %34 = arith.truncf %33 : vector<1x128xf32> to vector<1x128xbf16>
    %c0_28 = arith.constant 0 : index
    %c0_29 = arith.constant 0 : index
    %35 = vector.load %arg11[%c0_28, %c0_29] : memref<128x128xbf16, #tpu.memory_space<vmem>>, vector<128x128xbf16>
    %cst_30 = arith.constant dense<0.000000e+00> : vector<1x128xf32>
    %36 = tpu.matmul %34, %35, %cst_30 {dimension_numbers = #tpu.dot_dimension_numbers<[1], [0], [0], [1], [0, 0, 1, 1], [], []>} : vector<1x128xbf16>, vector<128x128xbf16>, vector<1x128xf32> -> vector<1x128xf32>
    %c0_31 = arith.constant 0 : index
    %c0_32 = arith.constant 0 : index
    %37 = vector.load %arg12[%c0_31, %c0_32] : memref<1x128xf32, #tpu.memory_space<vmem>>, vector<1x128xf32>
    %38 = arith.addf %36, %37 : vector<1x128xf32>
    %cst_33 = arith.constant dense<0xFF800000> : vector<1xf32>
    %39 = vector.multi_reduction <maximumf>, %38, %cst_33 [1] : vector<1x128xf32> to vector<1xf32>
    %40 = vector.shape_cast %39 : vector<1xf32> to vector<1x1xf32>
    %41 = vector.broadcast %40 : vector<1x1xf32> to vector<1x128xf32>
    %42 = arith.subf %38, %41 : vector<1x128xf32>
    %43 = math.exp %42 : vector<1x128xf32>
    %cst_34 = arith.constant dense<0.000000e+00> : vector<1xf32>
    %44 = vector.multi_reduction <add>, %43, %cst_34 [1] : vector<1x128xf32> to vector<1xf32>
    %45 = vector.shape_cast %44 : vector<1xf32> to vector<1x1xf32>
    %46 = vector.broadcast %45 : vector<1x1xf32> to vector<1x128xf32>
    %47 = arith.divf %43, %46 : vector<1x128xf32>
    tpu.wait_dma2 semaphore(%arg17 : memref<!tpu.dma_semaphore, #tpu.memory_space<semaphore_mem>>) src(%arg13 : memref<128x1152xbf16, #tpu.memory_space<any>>) dst(%arg16 : memref<128x1152xbf16, #tpu.memory_space<vmem>>)
    %48 = arith.truncf %21 : vector<1x128xf32> to vector<1x128xbf16>
    %c0_35 = arith.constant 0 : index
    %c0_36 = arith.constant 0 : index
    %49 = vector.load %arg16[%c0_35, %c0_36] : memref<128x1152xbf16, #tpu.memory_space<vmem>>, vector<128x1152xbf16>
    %cst_37 = arith.constant dense<0.000000e+00> : vector<1x1152xf32>
    %50 = tpu.matmul %48, %49, %cst_37 {dimension_numbers = #tpu.dot_dimension_numbers<[1], [0], [0], [1], [0, 0, 1, 1], [], []>} : vector<1x128xbf16>, vector<128x1152xbf16>, vector<1x1152xf32> -> vector<1x1152xf32>
    %c0_38 = arith.constant 0 : index
    %c0_39 = arith.constant 0 : index
    %51 = vector.load %arg14[%c0_38, %c0_39] : memref<1x1152xf32, #tpu.memory_space<vmem>>, vector<1x1152xf32>
    %52 = arith.addf %50, %51 : vector<1x1152xf32>
    %c0_40 = arith.constant 0 : index
    %c0_41 = arith.constant 0 : index
    %53 = vector.load %arg15[%c0_40, %c0_41] : memref<1x1280xf32, #tpu.memory_space<vmem>>, vector<1x1152xf32>
    tpu.vector_store %arg15[%c0_40, %c0_41], %52 {strides = array<i32>} : memref<1x1280xf32, #tpu.memory_space<vmem>>, vector<1x1152xf32>,
    %c0_42 = arith.constant 0 : index
    %c1152 = arith.constant 1152 : index
    %54 = vector.load %arg15[%c0_42, %c1152] : memref<1x1280xf32, #tpu.memory_space<vmem>>, vector<1x128xf32>
    tpu.vector_store %arg15[%c0_42, %c1152], %47 {strides = array<i32>} : memref<1x1280xf32, #tpu.memory_space<vmem>>, vector<1x128xf32>,
    return
  }
}

</mosaic_0001>

<bundles_post_ra>
// kernel: squeeze.3
= control target key start
LH: loop header
LB: loop body
LE: loop exit
PB: predicated region body
PF: predicated region fallthrough
CT: control target
= control target key end

     0   :  { %s86_s0 = inlined_call_operand.vmem [shape: f32[1024], index: 0, kind: input, shape index: {}]   ;;  %s87_s1 = inlined_call_operand.hbm [shape: f32[32,32], index: 1, kind: output, shape index: {}]  }
   0x1   :  { %v6_v0 = vld [vmem:[%s86_s0] sm:$0xff]  }
   0x2   :  { %2 = vsyncpa [#allocation1], 0  ;;  %s66_s0 = smov 96   ;;  %s67_s8 = smov 32   ;;  %vm4_vm0 = vcmask 261120  }
   0x3   :  { %7 = vrot.lane.b32.xlu0 %v6_v0, %s66_s0  ;;  %19 = vrot.lane.b32.xlu1 %v6_v0, %s67_s8  ;;  %s68_s9 = smov 64   ;;  %5 = vst.msk [vmem:[#allocation0] ss:$4 sm:$0xff] %vm4_vm0, %v6_v0   ;;  %s69_s10 = smov [#allocation0]  }
   0x4   :  { %s27_s11 = sshll.u32 %s69_s10, 4  ;;  %s29_s1 = sshll.u32 %s87_s1, 4  ;;  %s28_s11 = int_to_ptr.vmem [resolvable:$true] %s27_s11  ;;  %s30_s1 = int_to_ptr.hbm [resolvable:$true] %s29_s1 }
   0xb   :  { %13 = vrot.lane.b32.xlu0 %v6_v0, %s68_s9 }
  0x75   :  { %v8_v1 = vpop.permute.xlu0 %7   ;;  %v20_v2 = vpop.permute.xlu1 %19  }
  0x76   :  { %11 = vst.msk [vmem:[#allocation0 + $0x1] ss:$4 sm:$0xff] %vm4_vm0, %v8_v1  }
  0x77   :  { %23 = vst.msk [vmem:[#allocation0 + $0x3] ss:$4 sm:$0xff] %vm4_vm0, %v20_v2  }
  0x7d   :  { %v14_v3 = vpop.permute.xlu0 %13  }
  0x7e   :  { %17 = vst.msk [vmem:[#allocation0 + $0x2] ss:$4 sm:$0xff] %vm4_vm0, %v14_v3  }
  0x7f   :  { %32 = dma.vmem_to_hbm [thread:$0]  %s28_s11, 512, %s30_s1, [#allocation1]  }
  0x80   :  { %64 = dma.done.wait [#allocation1], 512  }
  0x81   :  { %65 = vsyncadd [#allocation1], 4294966784 }
  0x82   :  { %35 = vsyncpa [#allocation1], 1 }

// kernel: hyperfmp_forward.1
= control target key start
LH: loop header
LB: loop body
LE: loop exit
PB: predicated region body
PF: predicated region fallthrough
CT: control target
= control target key end

     0   :  { %20 = vsyncpa [#allocation5], 0  ;;  %s2417_s0 = inlined_call_operand.vmem [shape: f32[1,128], index: 0, kind: input, shape index: {}]   ;;  %s2418_s1 = inlined_call_operand.hbm [shape: bf16[128,256], index: 1, kind: input, shape index: {}]   ;;  %s2419_s2 = inlined_call_operand.vmem [shape: f32[1,256], index: 2, kind: input, shape index: {}]   ;;  %s2420_s3 = inlined_call_operand.hbm [shape: bf16[128,128], index: 3, kind: input, shape index: {}]   ;;  %s2421_s4 = inlined_call_operand.vmem [shape: f32[1,128], index: 4, kind: input, shape index: {}]   ;;  %s2422_s5 = inlined_call_operand.hbm [shape: bf16[128,128], index: 5, kind: input, shape index: {}]   ;;  %s2423_s6 = inlined_call_operand.vmem [shape: f32[1,128], index: 6, kind: input, shape index: {}]   ;;  %s2424_s7 = inlined_call_operand.hbm [shape: bf16[128,128], index: 7, kind: input, shape index: {}]   ;;  %s2425_s8 = inlined_call_operand.vmem [shape: f32[1,128], index: 8, kind: input, shape index: {}]   ;;  %s2426_s9 = inlined_call_operand.hbm [shape: bf16[128,128], index: 9, kind: input, shape index: {}]   ;;  %s2427_s10 = inlined_call_operand.vmem [shape: f32[1,128], index: 10, kind: input, shape index: {}]   ;;  %s2428_s11 = inlined_call_operand.hbm [shape: bf16[128,128], index: 11, kind: input, shape index: {}]   ;;  %s2429_s12 = inlined_call_operand.hbm [shape: f32[1,128], index: 12, kind: input, shape index: {}]   ;;  %s2430_s13 = inlined_call_operand.hbm [shape: bf16[128,1152], index: 13, kind: input, shape index: {}]   ;;  %s2431_s14 = inlined_call_operand.vmem [shape: f32[1,1152], index: 14, kind: input, shape index: {}]   ;;  %s2432_s15 = inlined_call_operand.vmem [shape: f32[1,1280], index: 15, kind: output, shape index: {}]  }
   0x1   :  { %21 = vsyncpa [#allocation7], 0 }
   0x2   :  { %22 = vsyncpa [#allocation10], 0  ;;  %s45_s20 = sshll.u32 %s2420_s3, 4  ;;  %s46_s20 = int_to_ptr.hbm [resolvable:$true] %s45_s20 }
   0x3   :  { %23 = vsyncpa [#allocation13], 0  ;;  %s2224_s21 = smov [#allocation6]   ;;  %s75_s25 = sshll.u32 %s2424_s7, 4  ;;  %s76_s25 = int_to_ptr.hbm [resolvable:$true] %s75_s25 }
   0x4   :  { %s47_s22 = sshll.u32 %s2224_s21, 4  ;;  %s2225_s26 = smov 64   ;;  %s48_s22 = int_to_ptr.vmem [resolvable:$true] %s47_s22 }
   0x5   :  { %s2226_s27 = smov 4   ;;  %s2227_s28 = smov [#allocation9]  }
   0x6   :  { %53 = dma.hbm_to_vmem [thread:$0]  %s46_s20, 1024, %s48_s22, [#allocation7], %s2225_s26, %s2225_s26, %s2226_s27  }
   0x7   :  { %s77_s29 = sshll.u32 %s2227_s28, 4  ;;  %s105_s16 = sshll.u32 %s2428_s11, 4  ;;  %s78_s29 = int_to_ptr.vmem [resolvable:$true] %s77_s29  ;;  %s106_s16 = int_to_ptr.hbm [resolvable:$true] %s105_s16 }
   0x8   :  { %83 = dma.hbm_to_vmem [thread:$0]  %s76_s25, 1024, %s78_s29, [#allocation10], %s2225_s26, %s2225_s26, %s2226_s27  }
   0x9   :  { %s30_s18 = sshll.u32 %s2418_s1, 4  ;;  %s2228_s19 = smov [#allocation12]   ;;  %s31_s18 = int_to_ptr.hbm [resolvable:$true] %s30_s18 }
   0xa   :  { %s107_s21 = sshll.u32 %s2228_s19, 4  ;;  %s2229_s20 = smov [#allocation4]   ;;  %s108_s21 = int_to_ptr.vmem [resolvable:$true] %s107_s21 }
   0xb   :  { %113 = dma.hbm_to_vmem [thread:$0]  %s106_s16, 1024, %s108_s21, [#allocation13], %s2225_s26, %s2225_s26, %s2226_s27  }
   0xc   :  { %s32_s11 = sshll.u32 %s2229_s20, 4  ;;  %s2230_s22 = smov 128   ;;  %s33_s11 = int_to_ptr.vmem [resolvable:$true] %s32_s11 }
   0xd   :  { %s2231_s23 = smov 8   ;;  %s60_s28 = sshll.u32 %s2422_s5, 4  ;;  %s61_s28 = int_to_ptr.hbm [resolvable:$true] %s60_s28 }
   0xe   :  { %38 = dma.hbm_to_vmem [thread:$0]  %s31_s18, 2048, %s33_s11, [#allocation5], %s2230_s22, %s2230_s22, %s2231_s23  }
   0xf   :  { %s2232_s1 = smov [#allocation8]   ;;  %s90_s7 = sshll.u32 %s2426_s9, 4  ;;  %s91_s7 = int_to_ptr.hbm [resolvable:$true] %s90_s7 }
  0x10   :  { %s62_s29 = sshll.u32 %s2232_s1, 4  ;;  %s2233_s16 = smov [#allocation11]   ;;  %s63_s29 = int_to_ptr.vmem [resolvable:$true] %s62_s29 }
  0x11   :  { %68 = dma.hbm_to_vmem [thread:$0]  %s61_s28, 1024, %s63_s29, [#allocation7], %s2225_s26, %s2225_s26, %s2226_s27  }
  0x12   :  { %s92_s17 = sshll.u32 %s2233_s16, 4  ;;  %s119_s21 = sshll.u32 %s2429_s12, 4  ;;  %s93_s17 = int_to_ptr.vmem [resolvable:$true] %s92_s17  ;;  %s120_s21 = int_to_ptr.hbm [resolvable:$true] %s119_s21 }
  0x13   :  { %98 = dma.hbm_to_vmem [thread:$0]  %s91_s7, 1024, %s93_s17, [#allocation10], %s2225_s26, %s2225_s26, %s2226_s27  }
  0x14   :  { %s2234_s5 = smov [#allocation14]  }
  0x15   :  { %s121_s20 = sshll.u32 %s2234_s5, 4  ;;  %s122_s20 = int_to_ptr.vmem [resolvable:$true] %s121_s20 }
  0x16   :  { %124 = dma.hbm_to_vmem [thread:$0]  %s120_s21, 16, %s122_s20, [#allocation13]  }
  0x17   :  { %2214 = dma.done.wait [#allocation5], 2048  }
  0x18   :  { %2215 = vsyncadd [#allocation5], 4294965248 }
  0x19   :  { %2216 = dma.done.wait [#allocation7], 2048  }
  0x1a   :  { %2217 = vsyncadd [#allocation7], 4294965248 }
  0x1b   :  { %2218 = dma.done.wait [#allocation10], 2048  }
  0x1c   :  { %2219 = vsyncadd [#allocation10], 4294965248 }
  0x1d   :  { %2220 = dma.done.wait [#allocation13], 1040  }
  0x1e   :  { %2221 = vsyncadd [#allocation13], 4294966256  ;;  %v1891_v0 = vld [vmem:[#allocation4 + $0x74] sm:$0xf]  ;;  %v1424_v1 = vld [vmem:[#allocation4 + $0x78] sm:$0xf0] }
  0x1f   :  { %v1889_v2 = vld [vmem:[#allocation4 + $0x64] sm:$0xf]  ;;  %v1427_v3 = vor.u32 %v1891_v0, %v1424_v1  ;;  %v1416_v4 = vld [vmem:[#allocation4 + $0x68] sm:$0xf0]  ;;  %v1887_v6 = vld [vmem:[#allocation4 + $0x54] sm:$0xf] }
  0x20   :  { %v1419_v5 = vor.u32 %v1889_v2, %v1416_v4  ;;  %v1408_v7 = vld [vmem:[#allocation4 + $0x58] sm:$0xf0]  ;;  %v1422_v8 = vld [vmem:[#allocation4 + $0x70] sm:$0xf]  ;;  %v1892_v9 = vld [vmem:[#allocation4 + $0x74] sm:$0xf0] }
  0x21   :  { %285 = vmatpush.bf16.msra.mxu1 %v1427_v3  ;;  %v1414_v10 = vld [vmem:[#allocation4 + $0x60] sm:$0xf]  ;;  %v1890_v11 = vld [vmem:[#allocation4 + $0x64] sm:$0xf0]  ;;  %v1411_v12 = vor.u32 %v1887_v6, %v1408_v7  ;;  %v1423_v13 = vor.u32 %v1892_v9, %v1422_v8  ;;  %v1885_v14 = vld [vmem:[#allocation4 + $0x44] sm:$0xf] }
  0x22   :  { %v1400_v15 = vld [vmem:[#allocation4 + $0x48] sm:$0xf0]  ;;  %v1415_v16 = vor.u32 %v1890_v11, %v1414_v10  ;;  %v1406_v17 = vld [vmem:[#allocation4 + $0x50] sm:$0xf]  ;;  %v1888_v18 = vld [vmem:[#allocation4 + $0x54] sm:$0xf0] }
  0x23   :  { %272 = vmatpush.bf16.msra.mxu0 %v1423_v13  ;;  %v1403_v19 = vor.u32 %v1885_v14, %v1400_v15  ;;  %v1883_v20 = vld [vmem:[#allocation4 + $0x34] sm:$0xf]  ;;  %v1392_v21 = vld [vmem:[#allocation4 + $0x38] sm:$0xf0]  ;;  %v1407_v22 = vor.u32 %v1888_v18, %v1406_v17  ;;  %v1398_v23 = vld [vmem:[#allocation4 + $0x40] sm:$0xf] }
  0x24   :  { %v1886_v24 = vld [vmem:[#allocation4 + $0x44] sm:$0xf0]  ;;  %v1395_v25 = vor.u32 %v1883_v20, %v1392_v21  ;;  %v1881_v26 = vld [vmem:[#allocation4 + $0x24] sm:$0xf]  ;;  %v1384_v27 = vld [vmem:[#allocation4 + $0x28] sm:$0xf0] }
  0x25   :  { %286 = vmatpush.bf16.msra.mxu1 %v1419_v5  ;;  %v1399_v28 = vor.u32 %v1886_v24, %v1398_v23  ;;  %v1390_v29 = vld [vmem:[#allocation4 + $0x30] sm:$0xf]  ;;  %v1884_v30 = vld [vmem:[#allocation4 + $0x34] sm:$0xf0]  ;;  %v1387_v31 = vor.u32 %v1881_v26, %v1384_v27  ;;  %v1879_v32 = vld [vmem:[#allocation4 + $0x14] sm:$0xf] }
  0x26   :  { %v1376_v33 = vld [vmem:[#allocation4 + $0x18] sm:$0xf0]  ;;  %v1391_v34 = vor.u32 %v1884_v30, %v1390_v29  ;;  %v1382_v35 = vld [vmem:[#allocation4 + $0x20] sm:$0xf]  ;;  %v1882_v36 = vld [vmem:[#allocation4 + $0x24] sm:$0xf0] }
  0x27   :  { %273 = vmatpush.bf16.msra.mxu0 %v1415_v16  ;;  %v1379_v37 = vor.u32 %v1879_v32, %v1376_v33  ;;  %v1877_v38 = vld [vmem:[#allocation4 + $0x4] sm:$0xf]  ;;  %v1368_v39 = vld [vmem:[#allocation4 + $0x8] sm:$0xf0]  ;;  %v1383_v40 = vor.u32 %v1882_v36, %v1382_v35  ;;  %v1374_v41 = vld [vmem:[#allocation4 + $0x10] sm:$0xf] }
  0x28   :  { %v1880_v42 = vld [vmem:[#allocation4 + $0x14] sm:$0xf0]  ;;  %v1371_v43 = vor.u32 %v1877_v38, %v1368_v39  ;;  %v168_v44 = vld [vmem:[%s2417_s0] sm:$0x1]  ;;  %v1878_v48 = vld [vmem:[#allocation4 + $0x4] sm:$0xf0] }
  0x29   :  { %287 = vmatpush.bf16.msra.mxu1 %v1411_v12  ;;  %v1375_v45 = vor.u32 %v1880_v42, %v1374_v41  ;;  %v169_v46 = vpack.c.bf16 %v168_v44, %v168_v44  ;;  %v1366_v47 = vld [vmem:[#allocation4] sm:$0xf]  ;;  %v1916_v50 = vld [vmem:[#allocation9 + $0x38] sm:$0xff]  ;;  %v1915_v51 = vld [vmem:[#allocation9 + $0x30] sm:$0xff]  ;;  %vm697_vm0 = vcmask 1040384   ;;  %s2235_s28 = smov [#allocation2]  }
  0x2a   :  { %v1367_v49 = vor.u32 %v1878_v48, %v1366_v47  ;;  %v1914_v52 = vld [vmem:[#allocation9 + $0x28] sm:$0xff]  ;;  %v1913_v53 = vld [vmem:[#allocation9 + $0x20] sm:$0xff]  ;;  %v1912_v54 = vld [vmem:[#allocation9 + $0x18] sm:$0xff]  ;;  %s164_s1 = sshll.u32 %s2235_s28, 4  ;;  %s165_s1 = int_to_ptr.vmem [resolvable:$true] %s164_s1 }
  0x2b   :  { %274 = vmatpush.bf16.msra.mxu0 %v1407_v22  ;;  %v1911_v55 = vld [vmem:[#allocation9 + $0x10] sm:$0xff]  ;;  %v1910_v56 = vld [vmem:[#allocation9 + $0x8] sm:$0xff]  ;;  %v1909_v57 = vld [vmem:[#allocation9] sm:$0xff] }
  0x2c   :  { %v1900_v58 = vld [vmem:[#allocation6 + $0x38] sm:$0xff]  ;;  %v1899_v59 = vld [vmem:[#allocation6 + $0x30] sm:$0xff]  ;;  %v1898_v62 = vld [vmem:[#allocation6 + $0x28] sm:$0xff] }
  0x2d   :  { %288 = vmatpush.bf16.msra.mxu1 %v1403_v19  ;;  %366 = vmatpush.bf16.msra.mxu2 %v1900_v58  ;;  %v1924_v60 = vld [vmem:[#allocation11 + $0x38] sm:$0xff]  ;;  %v1923_v61 = vld [vmem:[#allocation11 + $0x30] sm:$0xff]  ;;  %v1922_v63 = vld [vmem:[#allocation11 + $0x28] sm:$0xff] }
  0x2e   :  { %v1897_v0 = vld [vmem:[#allocation6 + $0x20] sm:$0xff]  ;;  %v1896_v2 = vld [vmem:[#allocation6 + $0x18] sm:$0xff]  ;;  %v1895_v5 = vld [vmem:[#allocation6 + $0x10] sm:$0xff] }
  0x2f   :  { %275 = vmatpush.bf16.msra.mxu0 %v1399_v28  ;;  %v1921_v1 = vld [vmem:[#allocation11 + $0x20] sm:$0xff]  ;;  %v1920_v3 = vld [vmem:[#allocation11 + $0x18] sm:$0xff]  ;;  %v1919_v6 = vld [vmem:[#allocation11 + $0x10] sm:$0xff] }
  0x30   :  { %v186_v4 = vld [vmem:[%s2419_s2] sm:$0x3]  ;;  %v1894_v8 = vld [vmem:[#allocation6 + $0x8] sm:$0xff]  ;;  %v1908_v23 = vld [vmem:[#allocation8 + $0x38] sm:$0xff] }
  0x31   :  { %289 = vmatpush.bf16.msra.mxu1 %v1395_v25  ;;  %367 = vmatpush.bf16.msra.mxu2 %v1899_v59  ;;  %v269_v7 = vperm.slane %v186_v4, 1  ;;  %v1893_v11 = vld [vmem:[#allocation6] sm:$0xff]  ;;  %v268_v13 = vperm.slane %v186_v4, 0  ;;  %v1918_v21 = vld [vmem:[#allocation11 + $0x8] sm:$0xff]  ;;  %v1932_v24 = vld [vmem:[#allocation12 + $0x38] sm:$0xff] }
  0x32   :  { %v1917_v22 = vld [vmem:[#allocation11] sm:$0xff]  ;;  %446 = vmatpush.bf16.msra.mxu3 %v1908_v23  ;;  %v1907_v25 = vld [vmem:[#allocation8 + $0x30] sm:$0xff]  ;;  %v1906_v27 = vld [vmem:[#allocation8 + $0x28] sm:$0xff] }
  0x33   :  { %276 = vmatpush.bf16.msra.mxu0 %v1391_v34  ;;  %v1931_v26 = vld [vmem:[#allocation12 + $0x30] sm:$0xff]  ;;  %v1930_v28 = vld [vmem:[#allocation12 + $0x28] sm:$0xff]  ;;  %v1905_v29 = vld [vmem:[#allocation8 + $0x20] sm:$0xff] }
  0x34   :  { %v1929_v30 = vld [vmem:[#allocation12 + $0x20] sm:$0xff]  ;;  %v1928_v32 = vld [vmem:[#allocation12 + $0x18] sm:$0xff]  ;;  %v1903_v33 = vld [vmem:[#allocation8 + $0x10] sm:$0xff] }
  0x35   :  { %290 = vmatpush.bf16.msra.mxu1 %v1387_v31  ;;  %368 = vmatpush.bf16.msra.mxu2 %v1898_v62  ;;  %v1904_v31 = vld [vmem:[#allocation8 + $0x18] sm:$0xff]  ;;  %v1927_v34 = vld [vmem:[#allocation12 + $0x10] sm:$0xff]  ;;  %v476_v35 = vld [vmem:[%s2425_s8] sm:$0x1] }
  0x36   :  { %447 = vmatpush.bf16.msra.mxu3 %v1907_v25  ;;  %v1902_v36 = vld [vmem:[#allocation8 + $0x8] sm:$0xff]  ;;  %v317_v44 = vld [vmem:[%s2421_s4] sm:$0x1] }
  0x37   :  { %277 = vmatpush.bf16.msra.mxu0 %v1383_v40  ;;  %v1901_v40 = vld [vmem:[#allocation8] sm:$0xff] }
  0x39   :  { %291 = vmatpush.bf16.msra.mxu1 %v1379_v37  ;;  %369 = vmatpush.bf16.msra.mxu2 %v1897_v0  ;;  %v1926_v37 = vld [vmem:[#allocation12 + $0x8] sm:$0xff] }
  0x3a   :  { %448 = vmatpush.bf16.msra.mxu3 %v1906_v27 }
  0x3b   :  { %278 = vmatpush.bf16.msra.mxu0 %v1375_v45 }
  0x3d   :  { %292 = vmatpush.bf16.msra.mxu1 %v1371_v43  ;;  %370 = vmatpush.bf16.msra.mxu2 %v1896_v2 }
  0x3e   :  { %449 = vmatpush.bf16.msra.mxu3 %v1905_v29 }
  0x3f   :  { %279 = vmatpush.bf16.msra.mxu0 %v1367_v49 }
  0x40   :  { %293 = vmatmul.bf16.vlgmr.msra.gmra.mxu1 %v169_v46 }
  0x41   :  { %605 = vmatpush.bf16.msrb.mxu1 %v1924_v60  ;;  %371 = vmatpush.bf16.msra.mxu2 %v1895_v5  ;;  %v635_v60 = vld [vmem:[#allocation14] sm:$0x1] }
  0x42   :  { %280 = vmatmul.bf16.vlgmr.msra.gmra.mxu0 %v169_v46  ;;  %450 = vmatpush.bf16.msra.mxu3 %v1904_v31 }
  0x43   :  { %525 = vmatpush.bf16.msrb.mxu0 %v1916_v50  ;;  %v1925_v50 = vld [vmem:[#allocation12] sm:$0xff] }
  0x45   :  { %606 = vmatpush.bf16.msrb.mxu1 %v1923_v61  ;;  %372 = vmatpush.bf16.msra.mxu2 %v1894_v8 }
  0x46   :  { %451 = vmatpush.bf16.msra.mxu3 %v1903_v33 }
  0x47   :  { %526 = vmatpush.bf16.msrb.mxu0 %v1915_v51  ;;  %v556_v51 = vld [vmem:[%s2427_s10] sm:$0x1]  ;;  %s162_s10 = sshll.u32 %s2430_s13, 4  ;;  %s163_s10 = int_to_ptr.hbm [resolvable:$true] %s162_s10 }
  0x48   :  { %167 = dma.hbm_to_vmem [thread:$0]  %s163_s10, 9216, %s165_s1, [#allocation3] }
  0x49   :  { %607 = vmatpush.bf16.msrb.mxu1 %v1922_v63  ;;  %373 = vmatpush.bf16.msra.mxu2 %v1893_v11 }
  0x4a   :  { %452 = vmatpush.bf16.msra.mxu3 %v1902_v36 }
  0x4b   :  { %527 = vmatpush.bf16.msrb.mxu0 %v1914_v52 }
  0x4d   :  { %608 = vmatpush.bf16.msrb.mxu1 %v1921_v1  ;;  %684 = vmatpush.bf16.msrb.mxu2 %v1932_v24 }
  0x4e   :  { %453 = vmatpush.bf16.msra.mxu3 %v1901_v40 }
  0x4f   :  { %528 = vmatpush.bf16.msrb.mxu0 %v1913_v53 }
  0x51   :  { %609 = vmatpush.bf16.msrb.mxu1 %v1920_v3  ;;  %685 = vmatpush.bf16.msrb.mxu2 %v1931_v26 }
  0x53   :  { %529 = vmatpush.bf16.msrb.mxu0 %v1912_v54 }
  0x55   :  { %610 = vmatpush.bf16.msrb.mxu1 %v1919_v6  ;;  %686 = vmatpush.bf16.msrb.mxu2 %v1930_v28 }
  0x57   :  { %530 = vmatpush.bf16.msrb.mxu0 %v1911_v55 }
  0x59   :  { %611 = vmatpush.bf16.msrb.mxu1 %v1918_v21  ;;  %687 = vmatpush.bf16.msrb.mxu2 %v1929_v30 }
  0x5b   :  { %531 = vmatpush.bf16.msrb.mxu0 %v1910_v56  ;;  %v397_v56 = vld [vmem:[%s2423_s6] sm:$0x1] }
  0x5d   :  { %612 = vmatpush.bf16.msrb.mxu1 %v1917_v22  ;;  %688 = vmatpush.bf16.msrb.mxu2 %v1928_v32 }
  0x5f   :  { %532 = vmatpush.bf16.msrb.mxu0 %v1909_v57 }
  0x61   :  { %689 = vmatpush.bf16.msrb.mxu2 %v1927_v34 }
  0x65   :  { %690 = vmatpush.bf16.msrb.mxu2 %v1926_v37 }
  0x69   :  { %691 = vmatpush.bf16.msrb.mxu2 %v1925_v50 }
  0xbd   :  { %v294_v9 = vpop.f32.mrf.mxu1 }
  0xbe   :  { %v295_v10 = vadd.f32 %v294_v9, %v269_v7 }
  0xbf   :  { %v281_v15 = vpop.f32.mrf.mxu0 }
  0xc0   :  { %v299_v12 = vmax.f32 %v295_v10, 0.0  ;;  %v282_v16 = vadd.f32 %v281_v15, %v268_v13 }
  0xc2   :  { %v459_v14 = vpack.c.bf16 %v299_v12, %v299_v12  ;;  %v298_v18 = vmax.f32 %v282_v16, 0.0 }
  0xc4   :  { %533 = vmatmul.bf16.vlgmr.msrb.gmra.mxu0 %v459_v14  ;;  %v300_v19 = vpack.c.bf16 %v298_v18, %v298_v18 }
  0xc5   :  { %v296_v17 = vpop.f32.mrf.mxu1 }
  0xc6   :  { %374 = vmatmul.bf16.vlgmr.msra.gmra.mxu2 %v300_v19 }
  0xc7   :  { %v283_v20 = vpop.f32.mrf.mxu0 }
 0x141   :  { %v534_v38 = vpop.f32.mrf.mxu0 }
 0x142   :  { %v535_v39 = vadd.f32 %v534_v38, %v476_v35 }
 0x144   :  { %v538_v41 = vmax.f32 %v535_v39, 0.0 }
 0x146   :  { %v539_v42 = vpack.c.bf16 %v538_v41, %v538_v41 }
 0x148   :  { %613 = vmatmul.bf16.vlgmr.msrb.gmra.mxu1 %v539_v42 }
 0x149   :  { %v536_v43 = vpop.f32.mrf.mxu0  ;;  %v375_v45 = vpop.f32.mrf.mxu2 }
 0x14a   :  { %v376_v46 = vadd.f32 %v375_v45, %v317_v44 }
 0x14c   :  { %v379_v47 = vmax.f32 %v376_v46, 0.0 }
 0x14e   :  { %v380_v48 = vpack.c.bf16 %v379_v47, %v379_v47 }
 0x150   :  { %454 = vmatmul.bf16.vlgmr.msra.gmra.mxu3 %v380_v48 }
 0x151   :  { %v377_v49 = vpop.f32.mrf.mxu2 }
 0x1c5   :  { %v614_v52 = vpop.f32.mrf.mxu1 }
 0x1c6   :  { %v615_v53 = vadd.f32 %v614_v52, %v556_v51 }
 0x1c8   :  { %v618_v54 = vpack.c.bf16 %v615_v53, %v615_v53 }
 0x1ca   :  { %692 = vmatmul.bf16.vlgmr.msrb.gmra.mxu2 %v618_v54 }
 0x1cd   :  { %v616_v55 = vpop.f32.mrf.mxu1 }
 0x1d3   :  { %v455_v57 = vpop.f32.mrf.mxu3 }
 0x1d4   :  { %v2370_v58 = vadd.f32 %v455_v57, %v397_v56 }
 0x1db   :  { %v457_v59 = vpop.f32.mrf.mxu3 }
 0x24d   :  { %v693_v61 = vpop.f32.mrf.mxu2 }
 0x24e   :  { %v694_v62 = vadd.f32 %v693_v61, %v635_v60 }
 0x250   :  { %v698_v63 = vsel %vm697_vm0, %v694_v62, -inf }
 0x251   :  { %699 = vmax.xlane.f32.xlu0 %v698_v63 }
 0x255   :  { %v695_v0 = vpop.f32.mrf.mxu2 }
 0x2c4   :  { %v700_v1 = vpop.xlane.xlu0 %699 }
 0x2c5   :  { %v701_v2 = vsub.f32 %v694_v62, %v700_v1 }
 0x2c7   :  { %v702_v3 = vmul.f32 1.442695, %v701_v2 }
 0x2c9   :  { %2017 = vpow2.f32 %v702_v3 }
 0x2cf   :  { %v2018_v4 = vpop.eup %2017 }
 0x2d0   :  { %v704_v5 = vsel %vm697_vm0, %v2018_v4, 0.0 }
 0x2d1   :  { %705 = vadd.xlane.f32.xlu0 %v704_v5 }
 0x344   :  { %v706_v6 = vpop.xlane.xlu0 %705 }
 0x345   :  { %2019 = vrcp.f32 %v706_v6  ;;  %v718_v10 = vand.u32 2147483648, %v706_v6  ;;  %v716_v12 = vand.u32 2147483647, %v706_v6  ;;  %vm712_vm2 = vweird.f32 %v706_v6 }
 0x347   :  { %v719_v14 = vor.u32 1.1754944e-38, %v718_v10  ;;  %vm717_vm4 = vcmp.eq.f32.partialorder %v716_v12, 8.507059e+37 }
 0x34b   :  { %v2020_v7 = vpop.eup %2019 }
 0x34c   :  { %v708_v8 = vmul.f32 %v2020_v7, %v706_v6  ;;  %vm713_vm1 = vweird.f32 %v2020_v7 }
 0x34d   :  { %vm714_vm3 = vmor %vm712_vm2, %vm713_vm1 }
 0x34e   :  { %v709_v9 = vsub.f32 1.0, %v708_v8 }
 0x350   :  { %v710_v11 = vmul.f32 %v2020_v7, %v709_v9 }
 0x352   :  { %v711_v13 = vadd.f32 %v2020_v7, %v710_v11 }
 0x354   :  { %v715_v15 = vsel %vm714_vm3, %v2020_v7, %v711_v13 }
 0x355   :  { %v720_v16 = vsel %vm717_vm4, %v719_v14, %v715_v15 }
 0x356   :  { %v2377_v17 = vmul.f32 %v2018_v4, %v720_v16 }
 0x357   :  { %2222 = dma.done.wait [#allocation3], 9216 }
 0x358   :  { %2223 = vsyncadd [#allocation3], 4294958080  ;;  %v1842_v18 = vld [vmem:[#allocation2 + $0x1f8] sm:$0xf]  ;;  %v2000_v19 = vld [vmem:[#allocation2 + $0x218] sm:$0xf0] }
 0x359   :  { %v1997_v20 = vld [vmem:[#allocation2 + $0x204] sm:$0xf]  ;;  %v1843_v21 = vor.u32 %v2000_v19, %v1842_v18  ;;  %v1852_v22 = vld [vmem:[#allocation2 + $0x224] sm:$0xf0]  ;;  %v1806_v23 = vld [vmem:[#allocation2 + $0x1b0] sm:$0xf] }
 0x35a   :  { %v1991_v24 = vld [vmem:[#allocation2 + $0x1d0] sm:$0xf0]  ;;  %v1855_v25 = vor.u32 %v1997_v20, %v1852_v22  ;;  %v1988_v26 = vld [vmem:[#allocation2 + $0x1bc] sm:$0xf]  ;;  %v1816_v27 = vld [vmem:[#allocation2 + $0x1dc] sm:$0xf0] }
 0x35b   :  { %v1996_v28 = vld [vmem:[#allocation2 + $0x1fc] sm:$0xf]  ;;  %1197 = vmatpush.bf16.msrb.mxu3 %v1843_v21  ;;  %v1807_v29 = vor.u32 %v1991_v24, %v1806_v23  ;;  %v1844_v30 = vld [vmem:[#allocation2 + $0x21c] sm:$0xf0]  ;;  %v2001_v32 = vld [vmem:[#allocation2 + $0x220] sm:$0xf0]  ;;  %v1819_v33 = vor.u32 %v1988_v26, %v1816_v27 }
 0x35c   :  { %v1850_v31 = vld [vmem:[#allocation2 + $0x200] sm:$0xf]  ;;  %1236 = vmatpush.bf16.msra.mxu2 %v1855_v25  ;;  %v1847_v34 = vor.u32 %v1996_v28, %v1844_v30  ;;  %v1770_v36 = vld [vmem:[#allocation2 + $0x168] sm:$0xf]  ;;  %v1982_v37 = vld [vmem:[#allocation2 + $0x188] sm:$0xf0] }
 0x35d   :  { %v1851_v35 = vor.u32 %v2001_v32, %v1850_v31  ;;  %v1979_v38 = vld [vmem:[#allocation2 + $0x174] sm:$0xf]  ;;  %v1780_v39 = vld [vmem:[#allocation2 + $0x194] sm:$0xf0]  ;;  %v1992_v44 = vld [vmem:[#allocation2 + $0x1d8] sm:$0xf0]  ;;  %v1771_v45 = vor.u32 %v1982_v37, %v1770_v36 }
 0x35e   :  { %v1987_v40 = vld [vmem:[#allocation2 + $0x1b4] sm:$0xf]  ;;  %v1808_v41 = vld [vmem:[#allocation2 + $0x1d4] sm:$0xf0]  ;;  %1210 = vmatpush.bf16.msra.mxu0 %v1847_v34  ;;  %v1734_v47 = vld [vmem:[#allocation2 + $0x120] sm:$0xf]  ;;  %v1783_v49 = vor.u32 %v1979_v38, %v1780_v39 }
 0x35f   :  { %1223 = vmatpush.bf16.msra.mxu1 %v1851_v35  ;;  %v1811_v42 = vor.u32 %v1987_v40, %v1808_v41  ;;  %v1814_v43 = vld [vmem:[#allocation2 + $0x1b8] sm:$0xf]  ;;  %1198 = vmatpush.bf16.msrb.mxu3 %v1807_v29  ;;  %v1973_v48 = vld [vmem:[#allocation2 + $0x140] sm:$0xf0]  ;;  %v1978_v50 = vld [vmem:[#allocation2 + $0x16c] sm:$0xf] }
 0x360   :  { %v1815_v46 = vor.u32 %v1992_v44, %v1814_v43  ;;  %1237 = vmatpush.bf16.msra.mxu2 %v1819_v33  ;;  %v1772_v51 = vld [vmem:[#allocation2 + $0x18c] sm:$0xf0]  ;;  %v1970_v53 = vld [vmem:[#allocation2 + $0x12c] sm:$0xf]  ;;  %v1983_v55 = vld [vmem:[#allocation2 + $0x190] sm:$0xf0]  ;;  %v1735_v60 = vor.u32 %v1973_v48, %v1734_v47 }
 0x361   :  { %v1778_v52 = vld [vmem:[#allocation2 + $0x170] sm:$0xf]  ;;  %v1775_v56 = vor.u32 %v1978_v50, %v1772_v51  ;;  %v1969_v59 = vld [vmem:[#allocation2 + $0x124] sm:$0xf]  ;;  %v1736_v61 = vld [vmem:[#allocation2 + $0x144] sm:$0xf0] }
 0x362   :  { %v1744_v54 = vld [vmem:[#allocation2 + $0x14c] sm:$0xf0]  ;;  %1211 = vmatpush.bf16.msra.mxu0 %v1811_v42  ;;  %v1779_v57 = vor.u32 %v1983_v55, %v1778_v52  ;;  %v1742_v62 = vld [vmem:[#allocation2 + $0x128] sm:$0xf]  ;;  %v1974_v63 = vld [vmem:[#allocation2 + $0x148] sm:$0xf0]  ;;  %v1739_v5 = vor.u32 %v1969_v59, %v1736_v61 }
 0x363   :  { %1224 = vmatpush.bf16.msra.mxu1 %v1815_v46  ;;  %1199 = vmatpush.bf16.msrb.mxu3 %v1771_v45  ;;  %v1747_v0 = vor.u32 %v1970_v53, %v1744_v54  ;;  %v1698_v1 = vld [vmem:[#allocation2 + $0xd8] sm:$0xf]  ;;  %v1964_v2 = vld [vmem:[#allocation2 + $0xf8] sm:$0xf0]  ;;  %v1961_v3 = vld [vmem:[#allocation2 + $0xe4] sm:$0xf]  ;;  %v1743_v6 = vor.u32 %v1974_v63, %v1742_v62 }
 0x364   :  { %1238 = vmatpush.bf16.msra.mxu2 %v1783_v49  ;;  %v1708_v4 = vld [vmem:[#allocation2 + $0x104] sm:$0xf0]  ;;  %v1960_v7 = vld [vmem:[#allocation2 + $0xdc] sm:$0xf]  ;;  %v1699_v8 = vor.u32 %v1964_v2, %v1698_v1  ;;  %v1700_v9 = vld [vmem:[#allocation2 + $0xfc] sm:$0xf0] }
 0x365   :  { %v1706_v10 = vld [vmem:[#allocation2 + $0xe0] sm:$0xf]  ;;  %v1965_v11 = vld [vmem:[#allocation2 + $0x100] sm:$0xf0]  ;;  %v1711_v12 = vor.u32 %v1961_v3, %v1708_v4  ;;  %v1662_v13 = vld [vmem:[#allocation2 + $0x90] sm:$0xf]  ;;  %v1703_v18 = vor.u32 %v1960_v7, %v1700_v9 }
 0x366   :  { %1212 = vmatpush.bf16.msra.mxu0 %v1775_v56  ;;  %v1955_v14 = vld [vmem:[#allocation2 + $0xb0] sm:$0xf0]  ;;  %v1952_v15 = vld [vmem:[#allocation2 + $0x9c] sm:$0xf]  ;;  %v1672_v16 = vld [vmem:[#allocation2 + $0xbc] sm:$0xf0]  ;;  %v1707_v19 = vor.u32 %v1965_v11, %v1706_v10  ;;  %v2381_v10 = vpack.c.bf16 %v2370_v58, %v2370_v58 }
 0x367   :  { %1225 = vmatpush.bf16.msra.mxu1 %v1779_v57  ;;  %1200 = vmatpush.bf16.msrb.mxu3 %v1735_v60  ;;  %v1951_v20 = vld [vmem:[#allocation2 + $0x94] sm:$0xf]  ;;  %v1663_v21 = vor.u32 %v1955_v14, %v1662_v13  ;;  %v1664_v22 = vld [vmem:[#allocation2 + $0xb4] sm:$0xf0]  ;;  %v1956_v24 = vld [vmem:[#allocation2 + $0xb8] sm:$0xf0]  ;;  %v1675_v25 = vor.u32 %v1952_v15, %v1672_v16 }
 0x368   :  { %1239 = vmatpush.bf16.msra.mxu2 %v1747_v0  ;;  %v1670_v23 = vld [vmem:[#allocation2 + $0x98] sm:$0xf]  ;;  %v1626_v26 = vld [vmem:[#allocation2 + $0x48] sm:$0xf]  ;;  %v1946_v27 = vld [vmem:[#allocation2 + $0x68] sm:$0xf0]  ;;  %v1667_v30 = vor.u32 %v1951_v20, %v1664_v22 }
 0x369   :  { %v1943_v28 = vld [vmem:[#allocation2 + $0x54] sm:$0xf]  ;;  %v1636_v29 = vld [vmem:[#allocation2 + $0x74] sm:$0xf0]  ;;  %v1671_v31 = vor.u32 %v1956_v24, %v1670_v23  ;;  %v1590_v32 = vld [vmem:[#allocation2] sm:$0xf]  ;;  %v1627_v34 = vor.u32 %v1946_v27, %v1626_v26 }
 0x36a   :  { %1213 = vmatpush.bf16.msra.mxu0 %v1739_v5  ;;  %v1942_v33 = vld [vmem:[#allocation2 + $0x4c] sm:$0xf]  ;;  %v1628_v35 = vld [vmem:[#allocation2 + $0x6c] sm:$0xf0]  ;;  %v1947_v37 = vld [vmem:[#allocation2 + $0x70] sm:$0xf0]  ;;  %v1639_v38 = vor.u32 %v1943_v28, %v1636_v29 }
 0x36b   :  { %1226 = vmatpush.bf16.msra.mxu1 %v1743_v6  ;;  %1201 = vmatpush.bf16.msrb.mxu3 %v1699_v8  ;;  %v1634_v36 = vld [vmem:[#allocation2 + $0x50] sm:$0xf]  ;;  %v1937_v39 = vld [vmem:[#allocation2 + $0x20] sm:$0xf0]  ;;  %v1934_v40 = vld [vmem:[#allocation2 + $0xc] sm:$0xf]  ;;  %v1631_v46 = vor.u32 %v1942_v33, %v1628_v35 }
 0x36c   :  { %1240 = vmatpush.bf16.msra.mxu2 %v1711_v12  ;;  %v1600_v41 = vld [vmem:[#allocation2 + $0x2c] sm:$0xf0]  ;;  %v1858_v42 = vld [vmem:[#allocation2 + $0x208] sm:$0xf]  ;;  %v2002_v43 = vld [vmem:[#allocation2 + $0x228] sm:$0xf0]  ;;  %v1635_v47 = vor.u32 %v1947_v37, %v1634_v36  ;;  %v1591_v50 = vor.u32 %v1937_v39, %v1590_v32 }
 0x36d   :  { %v1999_v44 = vld [vmem:[#allocation2 + $0x214] sm:$0xf]  ;;  %v1868_v45 = vld [vmem:[#allocation2 + $0x234] sm:$0xf0]  ;;  %v1933_v48 = vld [vmem:[#allocation2 + $0x4] sm:$0xf]  ;;  %v1603_v54 = vor.u32 %v1934_v40, %v1600_v41  ;;  %v1859_v55 = vor.u32 %v2002_v43, %v1858_v42 }
 0x36e   :  { %1214 = vmatpush.bf16.msra.mxu0 %v1703_v18  ;;  %v1592_v49 = vld [vmem:[#allocation2 + $0x24] sm:$0xf0]  ;;  %v1938_v52 = vld [vmem:[#allocation2 + $0x28] sm:$0xf0]  ;;  %v1860_v56 = vld [vmem:[#allocation2 + $0x22c] sm:$0xf0]  ;;  %v1871_v60 = vor.u32 %v1999_v44, %v1868_v45 }
 0x36f   :  { %1227 = vmatpush.bf16.msra.mxu1 %v1707_v19  ;;  %1202 = vmatpush.bf16.msrb.mxu3 %v1663_v21  ;;  %v1598_v51 = vld [vmem:[#allocation2 + $0x8] sm:$0xf]  ;;  %v1998_v53 = vld [vmem:[#allocation2 + $0x20c] sm:$0xf]  ;;  %v1866_v57 = vld [vmem:[#allocation2 + $0x210] sm:$0xf]  ;;  %v1595_v1 = vor.u32 %v1933_v48, %v1592_v49 }
 0x370   :  { %1241 = vmatpush.bf16.msra.mxu2 %v1675_v25  ;;  %v2003_v59 = vld [vmem:[#allocation2 + $0x230] sm:$0xf0]  ;;  %v1822_v61 = vld [vmem:[#allocation2 + $0x1c0] sm:$0xf]  ;;  %v1993_v62 = vld [vmem:[#allocation2 + $0x1e0] sm:$0xf0]  ;;  %v1599_v2 = vor.u32 %v1938_v52, %v1598_v51  ;;  %v1863_v3 = vor.u32 %v1998_v53, %v1860_v56 }
 0x371   :  { %v1990_v63 = vld [vmem:[#allocation2 + $0x1cc] sm:$0xf]  ;;  %v1832_v0 = vld [vmem:[#allocation2 + $0x1ec] sm:$0xf0]  ;;  %v1867_v4 = vor.u32 %v2003_v59, %v1866_v57  ;;  %v1989_v5 = vld [vmem:[#allocation2 + $0x1c4] sm:$0xf]  ;;  %v1823_v6 = vor.u32 %v1993_v62, %v1822_v61 }
 0x372   :  { %1215 = vmatpush.bf16.msra.mxu0 %v1667_v30  ;;  %v1824_v7 = vld [vmem:[#allocation2 + $0x1e4] sm:$0xf0]  ;;  %v1994_v9 = vld [vmem:[#allocation2 + $0x1e8] sm:$0xf0]  ;;  %v1835_v11 = vor.u32 %v1990_v63, %v1832_v0  ;;  %v1786_v12 = vld [vmem:[#allocation2 + $0x178] sm:$0xf] }
 0x373   :  { %1228 = vmatpush.bf16.msra.mxu1 %v1671_v31  ;;  %1203 = vmatpush.bf16.msrb.mxu3 %v1627_v34  ;;  %v1830_v8 = vld [vmem:[#allocation2 + $0x1c8] sm:$0xf]  ;;  %v1984_v13 = vld [vmem:[#allocation2 + $0x198] sm:$0xf0]  ;;  %v1981_v14 = vld [vmem:[#allocation2 + $0x184] sm:$0xf]  ;;  %v1827_v16 = vor.u32 %v1989_v5, %v1824_v7 }
 0x374   :  { %1242 = vmatpush.bf16.msra.mxu2 %v1639_v38  ;;  %v1796_v15 = vld [vmem:[#allocation2 + $0x1a4] sm:$0xf0]  ;;  %v1831_v18 = vor.u32 %v1994_v9, %v1830_v8  ;;  %v1980_v19 = vld [vmem:[#allocation2 + $0x17c] sm:$0xf]  ;;  %v1787_v20 = vor.u32 %v1984_v13, %v1786_v12  ;;  %v1788_v21 = vld [vmem:[#allocation2 + $0x19c] sm:$0xf0] }
 0x375   :  { %v1794_v22 = vld [vmem:[#allocation2 + $0x180] sm:$0xf]  ;;  %v1985_v23 = vld [vmem:[#allocation2 + $0x1a0] sm:$0xf0]  ;;  %v1799_v58 = vor.u32 %v1981_v14, %v1796_v15  ;;  %v1750_v24 = vld [vmem:[#allocation2 + $0x130] sm:$0xf]  ;;  %v1791_v28 = vor.u32 %v1980_v19, %v1788_v21 }
 0x376   :  { %1216 = vmatpush.bf16.msra.mxu0 %v1631_v46  ;;  %v1975_v25 = vld [vmem:[#allocation2 + $0x150] sm:$0xf0]  ;;  %v1972_v26 = vld [vmem:[#allocation2 + $0x13c] sm:$0xf]  ;;  %v1760_v27 = vld [vmem:[#allocation2 + $0x15c] sm:$0xf0]  ;;  %v1795_v29 = vor.u32 %v1985_v23, %v1794_v22 }
 0x377   :  { %1229 = vmatpush.bf16.msra.mxu1 %v1635_v47  ;;  %1204 = vmatpush.bf16.msrb.mxu3 %v1591_v50  ;;  %v1971_v30 = vld [vmem:[#allocation2 + $0x134] sm:$0xf]  ;;  %v1751_v31 = vor.u32 %v1975_v25, %v1750_v24  ;;  %v1752_v32 = vld [vmem:[#allocation2 + $0x154] sm:$0xf0]  ;;  %v1976_v34 = vld [vmem:[#allocation2 + $0x158] sm:$0xf0]  ;;  %v1763_v35 = vor.u32 %v1972_v26, %v1760_v27 }
 0x378   :  { %1243 = vmatpush.bf16.msra.mxu2 %v1603_v54  ;;  %v1758_v33 = vld [vmem:[#allocation2 + $0x138] sm:$0xf]  ;;  %v1714_v36 = vld [vmem:[#allocation2 + $0xe8] sm:$0xf]  ;;  %v1966_v37 = vld [vmem:[#allocation2 + $0x108] sm:$0xf0]  ;;  %v1755_v40 = vor.u32 %v1971_v30, %v1752_v32 }
 0x379   :  { %v1963_v38 = vld [vmem:[#allocation2 + $0xf4] sm:$0xf]  ;;  %v1724_v39 = vld [vmem:[#allocation2 + $0x114] sm:$0xf0]  ;;  %v1759_v41 = vor.u32 %v1976_v34, %v1758_v33  ;;  %v1962_v42 = vld [vmem:[#allocation2 + $0xec] sm:$0xf]  ;;  %v1715_v43 = vor.u32 %v1966_v37, %v1714_v36 }
 0x37a   :  { %1217 = vmatpush.bf16.msra.mxu0 %v1595_v1  ;;  %1205 = vmatmul.bf16.vlgmr.msrb.gmra.mxu3 %v2381_v10  ;;  %v1716_v44 = vld [vmem:[#allocation2 + $0x10c] sm:$0xf0]  ;;  %v1967_v46 = vld [vmem:[#allocation2 + $0x110] sm:$0xf0]  ;;  %v1727_v47 = vor.u32 %v1963_v38, %v1724_v39  ;;  %v1678_v48 = vld [vmem:[#allocation2 + $0xa0] sm:$0xf] }
 0x37b   :  { %1249 = vmatpush.bf16.msra.mxu3 %v1859_v55  ;;  %1230 = vmatpush.bf16.msra.mxu1 %v1599_v2  ;;  %v1722_v45 = vld [vmem:[#allocation2 + $0xf0] sm:$0xf]  ;;  %v1957_v49 = vld [vmem:[#allocation2 + $0xc0] sm:$0xf0]  ;;  %v1954_v50 = vld [vmem:[#allocation2 + $0xac] sm:$0xf]  ;;  %v1719_v52 = vor.u32 %v1962_v42, %v1716_v44 }
 0x37c   :  { %1288 = vmatpush.bf16.msrb.mxu2 %v1871_v60  ;;  %v1688_v51 = vld [vmem:[#allocation2 + $0xcc] sm:$0xf0]  ;;  %v1723_v53 = vor.u32 %v1967_v46, %v1722_v45  ;;  %v1953_v54 = vld [vmem:[#allocation2 + $0xa4] sm:$0xf]  ;;  %v1679_v55 = vor.u32 %v1957_v49, %v1678_v48  ;;  %v1680_v56 = vld [vmem:[#allocation2 + $0xc4] sm:$0xf0] }
 0x37d   :  { %1244 = vmatmul.bf16.vlgmr.msra.gmra.mxu2 %v2381_v10  ;;  %1218 = vmatmul.bf16.vlgmr.msra.gmra.mxu0 %v2381_v10  ;;  %v1686_v57 = vld [vmem:[#allocation2 + $0xa8] sm:$0xf]  ;;  %v1958_v59 = vld [vmem:[#allocation2 + $0xc8] sm:$0xf0]  ;;  %v1691_v60 = vor.u32 %v1954_v50, %v1688_v51  ;;  %v1642_v61 = vld [vmem:[#allocation2 + $0x58] sm:$0xf]  ;;  %v1683_v1 = vor.u32 %v1953_v54, %v1680_v56 }
 0x37e   :  { %1262 = vmatpush.bf16.msrb.mxu0 %v1863_v3  ;;  %1231 = vmatmul.bf16.vlgmr.msra.gmra.mxu1 %v2381_v10  ;;  %v1948_v62 = vld [vmem:[#allocation2 + $0x78] sm:$0xf0]  ;;  %v1945_v63 = vld [vmem:[#allocation2 + $0x64] sm:$0xf]  ;;  %v1652_v0 = vld [vmem:[#allocation2 + $0x84] sm:$0xf0]  ;;  %v1687_v2 = vor.u32 %v1958_v59, %v1686_v57 }
 0x37f   :  { %1275 = vmatpush.bf16.msrb.mxu1 %v1867_v4  ;;  %1250 = vmatpush.bf16.msra.mxu3 %v1823_v6  ;;  %v1944_v3 = vld [vmem:[#allocation2 + $0x5c] sm:$0xf]  ;;  %v1643_v4 = vor.u32 %v1948_v62, %v1642_v61  ;;  %v1644_v5 = vld [vmem:[#allocation2 + $0x7c] sm:$0xf0]  ;;  %v1949_v7 = vld [vmem:[#allocation2 + $0x80] sm:$0xf0]  ;;  %v1655_v8 = vor.u32 %v1945_v63, %v1652_v0 }
 0x380   :  { %1289 = vmatpush.bf16.msrb.mxu2 %v1835_v11  ;;  %v1650_v6 = vld [vmem:[#allocation2 + $0x60] sm:$0xf]  ;;  %v1606_v9 = vld [vmem:[#allocation2 + $0x10] sm:$0xf]  ;;  %v1939_v11 = vld [vmem:[#allocation2 + $0x30] sm:$0xf0] }
 0x381   :  { %v1936_v12 = vld [vmem:[#allocation2 + $0x1c] sm:$0xf]  ;;  %v1616_v13 = vld [vmem:[#allocation2 + $0x3c] sm:$0xf0]  ;;  %v1874_v14 = vld [vmem:[#allocation2 + $0x218] sm:$0xf]  ;;  %v1607_v19 = vor.u32 %v1939_v11, %v1606_v9 }
 0x382   :  { %1263 = vmatpush.bf16.msrb.mxu0 %v1827_v16  ;;  %v2004_v15 = vld [vmem:[#allocation2 + $0x238] sm:$0xf0]  ;;  %v1647_v16 = vor.u32 %v1944_v3, %v1644_v5  ;;  %v1608_v21 = vld [vmem:[#allocation2 + $0x34] sm:$0xf0]  ;;  %v1619_v22 = vor.u32 %v1936_v12, %v1616_v13  ;;  %v1838_v25 = vld [vmem:[#allocation2 + $0x1d0] sm:$0xf] }
 0x383   :  { %1276 = vmatpush.bf16.msrb.mxu1 %v1831_v18  ;;  %1251 = vmatpush.bf16.msra.mxu3 %v1787_v20  ;;  %v1651_v18 = vor.u32 %v1949_v7, %v1650_v6  ;;  %v1935_v20 = vld [vmem:[#allocation2 + $0x14] sm:$0xf]  ;;  %v1875_v23 = vor.u32 %v2004_v15, %v1874_v14  ;;  %v1940_v24 = vld [vmem:[#allocation2 + $0x38] sm:$0xf0]  ;;  %v1802_v30 = vld [vmem:[#allocation2 + $0x188] sm:$0xf]  ;;  %v1344_v7 = vlaneseq }
 0x384   :  { %1290 = vmatpush.bf16.msrb.mxu2 %v1799_v58  ;;  %v1614_v58 = vld [vmem:[#allocation2 + $0x18] sm:$0xf]  ;;  %v1995_v26 = vld [vmem:[#allocation2 + $0x1f0] sm:$0xf0]  ;;  %v1611_v27 = vor.u32 %v1935_v20, %v1608_v21  ;;  %v1766_v33 = vld [vmem:[#allocation2 + $0x140] sm:$0xf] }
 0x385   :  { %v1977_v34 = vld [vmem:[#allocation2 + $0x160] sm:$0xf0]  ;;  %v1730_v36 = vld [vmem:[#allocation2 + $0xf8] sm:$0xf]  ;;  %v1968_v37 = vld [vmem:[#allocation2 + $0x118] sm:$0xf0] }
 0x386   :  { %1264 = vmatpush.bf16.msrb.mxu0 %v1791_v28  ;;  %v1615_v28 = vor.u32 %v1940_v24, %v1614_v58  ;;  %v1731_v38 = vor.u32 %v1968_v37, %v1730_v36  ;;  %v1694_v39 = vld [vmem:[#allocation2 + $0xb0] sm:$0xf]  ;;  %v1658_v42 = vld [vmem:[#allocation2 + $0x68] sm:$0xf]  ;;  %v1622_v45 = vld [vmem:[#allocation2 + $0x20] sm:$0xf] }
 0x387   :  { %1277 = vmatpush.bf16.msrb.mxu1 %v1795_v29  ;;  %1252 = vmatpush.bf16.msra.mxu3 %v1751_v31  ;;  %v1839_v29 = vor.u32 %v1995_v26, %v1838_v25  ;;  %v1986_v31 = vld [vmem:[#allocation2 + $0x1a8] sm:$0xf0]  ;;  %v1941_v46 = vld [vmem:[#allocation2 + $0x40] sm:$0xf0]  ;;  %vm2395_vm5 = vcmp.lt.s32.totalorder %v1344_v7, 128  ;;  %vm1330_vm6 = vcmask 1042434  }
 0x388   :  { %1291 = vmatpush.bf16.msrb.mxu2 %v1763_v35  ;;  %v1803_v32 = vor.u32 %v1986_v31, %v1802_v30  ;;  %v1767_v35 = vor.u32 %v1977_v34, %v1766_v33  ;;  %v807_v56 = vld [vmem:[%s2431_s14] sm:$0xff]  ;;  %1349 = vst.msk [vmem:[%s2432_s15 + $0x9] sm:$0x1] %vm2395_vm5, %v2377_v17  ;;  %vm1334_vm7 = vcmask 1044484   ;;  %vm1332_vm8 = vcmask 1041408  }
 0x389   :  { %v1180_v57 = vperm.slane %v807_v56, 1  ;;  %v1181_v59 = vperm.slane %v807_v56, 2  ;;  %v1184_v61 = vperm.slane %v807_v56, 5  ;;  %v1185_v63 = vperm.slane %v807_v56, 6  ;;  %v2021_v33 = vld [vmem:[%s2431_s14 + $0x8] ss:$0 sm:$0xff] }
 0x38a   :  { %1265 = vmatpush.bf16.msrb.mxu0 %v1755_v40  ;;  %v1959_v40 = vld [vmem:[#allocation2 + $0xd0] sm:$0xf0]  ;;  %v1179_v0 = vperm.slane %v807_v56, 0  ;;  %v1186_v6 = vperm.slane %v807_v56, 7  ;;  %vm1336_vm9 = vcmask 1046534   ;;  %vm1338_vm10 = vcmask 1045508  }
 0x38b   :  { %1278 = vmatpush.bf16.msrb.mxu1 %v1759_v41  ;;  %1253 = vmatpush.bf16.msra.mxu3 %v1715_v43  ;;  %v1695_v41 = vor.u32 %v1959_v40, %v1694_v39  ;;  %v1950_v43 = vld [vmem:[#allocation2 + $0x88] sm:$0xf0]  ;;  %vm1340_vm11 = vcmask 1043456  }
 0x38c   :  { %1292 = vmatpush.bf16.msrb.mxu2 %v1727_v47  ;;  %v1659_v44 = vor.u32 %v1950_v43, %v1658_v42  ;;  %v1623_v47 = vor.u32 %v1941_v46, %v1622_v45 }
 0x38e   :  { %1266 = vmatpush.bf16.msrb.mxu0 %v1719_v52 }
 0x38f   :  { %1279 = vmatpush.bf16.msrb.mxu1 %v1723_v53  ;;  %1254 = vmatpush.bf16.msra.mxu3 %v1679_v55 }
 0x390   :  { %1293 = vmatpush.bf16.msrb.mxu2 %v1691_v60  ;;  %v1182_v60 = vperm.slane %v807_v56, 3 }
 0x392   :  { %1267 = vmatpush.bf16.msrb.mxu0 %v1683_v1 }
 0x393   :  { %1280 = vmatpush.bf16.msrb.mxu1 %v1687_v2  ;;  %1255 = vmatpush.bf16.msra.mxu3 %v1643_v4  ;;  %v1183_v2 = vperm.slane %v807_v56, 4 }
 0x394   :  { %1294 = vmatpush.bf16.msrb.mxu2 %v1655_v8 }
 0x396   :  { %1268 = vmatpush.bf16.msrb.mxu0 %v1647_v16 }
 0x397   :  { %1281 = vmatpush.bf16.msrb.mxu1 %v1651_v18  ;;  %1256 = vmatpush.bf16.msra.mxu3 %v1607_v19 }
 0x398   :  { %1295 = vmatpush.bf16.msrb.mxu2 %v1619_v22 }
 0x39a   :  { %1257 = vmatmul.bf16.vlgmr.msra.gmra.mxu3 %v2381_v10  ;;  %1269 = vmatpush.bf16.msrb.mxu0 %v1611_v27 }
 0x39b   :  { %1301 = vmatpush.bf16.msrb.mxu3 %v1875_v23  ;;  %1296 = vmatmul.bf16.vlgmr.msrb.gmra.mxu2 %v2381_v10 }
 0x39c   :  { %1282 = vmatpush.bf16.msrb.mxu1 %v1615_v28 }
 0x39d   :  { %1270 = vmatmul.bf16.vlgmr.msrb.gmra.mxu0 %v2381_v10 }
 0x39f   :  { %1302 = vmatpush.bf16.msrb.mxu3 %v1839_v29  ;;  %1283 = vmatmul.bf16.vlgmr.msrb.gmra.mxu1 %v2381_v10 }
 0x3a3   :  { %1303 = vmatpush.bf16.msrb.mxu3 %v1803_v32 }
 0x3a7   :  { %1304 = vmatpush.bf16.msrb.mxu3 %v1767_v35 }
 0x3ab   :  { %1305 = vmatpush.bf16.msrb.mxu3 %v1731_v38 }
 0x3af   :  { %1306 = vmatpush.bf16.msrb.mxu3 %v1695_v41 }
 0x3b3   :  { %1307 = vmatpush.bf16.msrb.mxu3 %v1659_v44 }
 0x3b7   :  { %1308 = vmatpush.bf16.msrb.mxu3 %v1623_v47 }
 0x3ba   :  { %1309 = vmatmul.bf16.vlgmr.msrb.gmra.mxu3 %v2381_v10 }
 0x3fa   :  { %v1219_v48 = vpop.f32.mrf.mxu0 }
 0x3fb   :  { %v1232_v49 = vpop.f32.mrf.mxu1  ;;  %v1220_v62 = vadd.f32 %v1219_v48, %v1180_v57 }
 0x3fc   :  { %v1233_v10 = vadd.f32 %v1232_v49, %v1181_v59 }
 0x3fd   :  { %v1206_v51 = vpop.f32.mrf.mxu3  ;;  %v1322_v8 = vrot.slane %v1220_v62, 7 }
 0x3fe   :  { %v1207_v11 = vadd.f32 %v1206_v51, %v1179_v0  ;;  %v1323_v12 = vrot.slane %v1233_v10, 6 }
 0x400   :  { %v1245_v50 = vpop.f32.mrf.mxu2  ;;  %v1329_v23 = vsel %vm697_vm0, %v1207_v11, %v1322_v8 }
 0x401   :  { %v1246_v1 = vadd.f32 %v1245_v50, %v1182_v60 }
 0x402   :  { %v1221_v52 = vpop.f32.mrf.mxu0 }
 0x403   :  { %v1234_v53 = vpop.f32.mrf.mxu1  ;;  %v1324_v13 = vrot.slane %v1246_v1, 5 }
 0x405   :  { %v1208_v55 = vpop.f32.mrf.mxu3  ;;  %v1331_v58 = vsel %vm1330_vm6, %v1323_v12, %v1324_v13 }
 0x406   :  { %v1333_v29 = vsel %vm1332_vm8, %v1329_v23, %v1331_v58 }
 0x408   :  { %v1247_v54 = vpop.f32.mrf.mxu2 }
 0x41a   :  { %v1271_v3 = vpop.f32.mrf.mxu0 }
 0x41b   :  { %v1272_v4 = vadd.f32 %v1271_v3, %v1184_v61 }
 0x41c   :  { %v1284_v5 = vpop.f32.mrf.mxu1 }
 0x41d   :  { %v1285_v9 = vadd.f32 %v1284_v5, %v1185_v63  ;;  %v1258_v14 = vpop.f32.mrf.mxu3  ;;  %v1326_v18 = vrot.slane %v1272_v4, 3 }
 0x41e   :  { %v1259_v16 = vadd.f32 %v1258_v14, %v1183_v2  ;;  %v1297_v19 = vpop.f32.mrf.mxu2 }
 0x41f   :  { %v1327_v20 = vrot.slane %v1285_v9, 2  ;;  %v1298_v21 = vadd.f32 %v1297_v19, %v1186_v6 }
 0x420   :  { %v1325_v22 = vrot.slane %v1259_v16, 4 }
 0x421   :  { %v1328_v24 = vrot.slane %v1298_v21, 1 }
 0x422   :  { %v1335_v25 = vsel %vm1334_vm7, %v1325_v22, %v1326_v18  ;;  %v1273_v26 = vpop.f32.mrf.mxu0 }
 0x423   :  { %v1337_v27 = vsel %vm1336_vm9, %v1327_v20, %v1328_v24 }
 0x424   :  { %v1286_v28 = vpop.f32.mrf.mxu1  ;;  %v1339_v30 = vsel %vm1338_vm10, %v1335_v25, %v1337_v27 }
 0x425   :  { %v1341_v31 = vsel %vm1340_vm11, %v1333_v29, %v1339_v30  ;;  %v1260_v17 = vpop.f32.mrf.mxu3 }
 0x426   :  { %1343 = vst [vmem:[%s2432_s15] sm:$0xff] %v1341_v31  ;;  %v1299_v32 = vpop.f32.mrf.mxu2 }
 0x43d   :  { %v1310_v34 = vpop.f32.mrf.mxu3 }
 0x43e   :  { %v1311_v35 = vadd.f32 %v2021_v33, %v1310_v34 }
 0x440   :  { %1348 = vst.msk [vmem:[%s2432_s15 + $0x8] sm:$0x1] %vm2395_vm5, %v1311_v35 }
 0x445   :  { %v1312_v36 = vpop.f32.mrf.mxu3 }
 0x446   :  { %1354 = vsyncpa [#allocation5], 1 }
 0x447   :  { %1355 = vsyncpa [#allocation7], 1 }
 0x448   :  { %1356 = vsyncpa [#allocation10], 1 }
 0x449   :  { %1357 = vsyncpa [#allocation13], 1 }
 0x44a   :  { %1358 = vsyncmov [#allocation3] }
 0x44d   :  { %s1359_s5 = vpop.sfrf %1358 }
 0x44e   :  { %p1876_p0 = scmp.ne.s32.totalorder %s1359_s5, 0 }
 0x450   :  { %1363 = shalt.err (%p1876_p0)  }

</bundles_post_ra>
